<compile_context>
chip_gen: v6e
topology: v6e:2x2x1
jax: 0.10.0
libtpu: 0.0.40
codegen_flags: <defaults>
</compile_context>

<pallas_src>
import jax
import jax.numpy as jnp
from jax import lax
from jax.experimental import pallas as pl
from jax.experimental.pallas import tpu as pltpu


def linear_kernel(x_ref, w_ref, b_ref, o_ref):
    # x_ref: (M, K) activations
    # w_ref: (N, K) weight in PyTorch layout (no host-side transpose)
    # b_ref: (1, N) bias
    # o_ref: (M, N) output
    acc = lax.dot_general(
        x_ref[...],
        w_ref[...],
        dimension_numbers=(((1,), (1,)), ((), ())),  # contract K with K
        preferred_element_type=jnp.float32,
    )
    o_ref[...] = (acc + b_ref[...]).astype(o_ref.dtype)


def linear_pallas(x, weight, bias):
    """y = x @ weight.T + bias, with x: [B, S, K], weight: [N, K], bias: [N]."""
    B, S, K = x.shape
    N = weight.shape[0]
    M = B * S

    x2 = x.reshape(M, K)
    b2 = bias.reshape(1, N)

    bytes_accessed = 4 * (M * K + N * K + N + M * N)  # f32 in/out traffic
    cost = pl.CostEstimate(
        flops=2 * M * N * K,
        transcendentals=0,
        bytes_accessed=bytes_accessed,
    )

    # Single-block kernel: no grid, every operand resident in VMEM.
    y2 = pl.pallas_call(
        linear_kernel,
        out_shape=jax.ShapeDtypeStruct((M, N), x.dtype),
        in_specs=[
            pl.BlockSpec((M, K), lambda: (0, 0)),
            pl.BlockSpec((N, K), lambda: (0, 0)),
            pl.BlockSpec((1, N), lambda: (0, 0)),
        ],
        out_specs=pl.BlockSpec((M, N), lambda: (0, 0)),
        cost_estimate=cost,
    )(x2, weight, b2)

    return y2.reshape(B, S, N)


if __name__ == "__main__":
    key = jax.random.PRNGKey(0)
    k_x, k_w, k_b = jax.random.split(key, 3)

    # Shapes implied by the module: x [1, 384, 256], Linear(256 -> 256).
    B, S, H_in, H_out = 1, 384, 256, 256

    x = jax.random.normal(k_x, (B, S, H_in), dtype=jnp.float32)
    weight = jax.random.normal(k_w, (H_out, H_in), dtype=jnp.float32) * 0.02
    bias = jax.random.normal(k_b, (H_out,), dtype=jnp.float32) * 0.02

    y = linear_pallas(x, weight, bias)
    y = jax.block_until_ready(y)

    # Reference check (plain JAX) for correctness.
    y_ref = jnp.einsum("bsk,nk->bsn", x, weight) + bias
    assert y.shape == (B, S, H_out)
    assert jnp.allclose(y, y_ref, atol=1e-4, rtol=1e-4)

    print("KERNEL_OK")
</pallas_src>

<mosaic_0001>
module attributes {stable_mosaic.version = 11 : i64} {
  func.func @linear_kernel(%arg0: memref<384x256xf32, #tpu.memory_space<vmem>>, %arg1: memref<256x256xf32, #tpu.memory_space<vmem>>, %arg2: memref<1x256xf32, #tpu.memory_space<vmem>>, %arg3: memref<384x256xf32, #tpu.memory_space<vmem>>) attributes {dimension_semantics = [], scalar_prefetch = 0 : i64, scratch_operands = 0 : i64, tpu.core_type = #tpu.core_type<tc>} {
    %c0 = arith.constant 0 : index
    %c0_0 = arith.constant 0 : index
    %0 = vector.load %arg0[%c0, %c0_0] : memref<384x256xf32, #tpu.memory_space<vmem>>, vector<384x256xf32>
    %c0_1 = arith.constant 0 : index
    %c0_2 = arith.constant 0 : index
    %1 = vector.load %arg1[%c0_1, %c0_2] : memref<256x256xf32, #tpu.memory_space<vmem>>, vector<256x256xf32>
    %cst = arith.constant dense<0.000000e+00> : vector<384x256xf32>
    %2 = tpu.matmul %0, %1, %cst {dimension_numbers = #tpu.dot_dimension_numbers<[1], [1], [0], [0], [0, 0, 1, 0], [], []>} : vector<384x256xf32>, vector<256x256xf32>, vector<384x256xf32> -> vector<384x256xf32>
    %c0_3 = arith.constant 0 : index
    %c0_4 = arith.constant 0 : index
    %3 = vector.load %arg2[%c0_3, %c0_4] : memref<1x256xf32, #tpu.memory_space<vmem>>, vector<1x256xf32>
    %4 = vector.broadcast %3 : vector<1x256xf32> to vector<384x256xf32>
    %5 = arith.addf %2, %4 : vector<384x256xf32>
    %c0_5 = arith.constant 0 : index
    %c0_6 = arith.constant 0 : index
    %6 = vector.load %arg3[%c0_5, %c0_6] : memref<384x256xf32, #tpu.memory_space<vmem>>, vector<384x256xf32>
    tpu.vector_store %arg3[%c0_5, %c0_6], %5 {strides = array<i32>} : memref<384x256xf32, #tpu.memory_space<vmem>>, vector<384x256xf32>,
    return
  }
}

</mosaic_0001>

<bundles_post_ra>
// kernel: tpu_custom_call.1
= control target key start
LH: loop header
LB: loop body
LE: loop exit
PB: predicated region body
PF: predicated region fallthrough
CT: control target
= control target key end

     0   :  { %8 = vsyncpa [#allocation3], 0  ;;  %s963_s0 = inlined_call_operand.hbm [shape: f32[384,256], index: 0, kind: input, shape index: {}]   ;;  %s964_s1 = inlined_call_operand.hbm [shape: f32[256,256], index: 1, kind: input, shape index: {}]   ;;  %s965_s2 = inlined_call_operand.vmem [shape: f32[1,256], index: 2, kind: input, shape index: {}]   ;;  %s966_s3 = inlined_call_operand.hbm [shape: f32[384,256], index: 3, kind: output, shape index: {}]  }
   0x1   :  { %9 = vsyncpa [#allocation6], 0 }
   0x2   :  { %10 = vsyncpa [#allocation4], 0  ;;  %s817_s12 = smov [#allocation2]  }
   0x3   :  { %s16_s13 = sshll.u32 %s817_s12, 4  ;;  %s17_s13 = int_to_ptr.vmem [resolvable:$true] %s16_s13 }
   0x4   :  { %s759_s14 = scalar_lea.vmem %s17_s13, 12288  ;;  %p764_p1 = scmp.lt.s32.totalorder %s17_s13, %s17_s13 }
   0x5   :  { %p760_p0 = scmp.ne.s32.totalorder %s17_s13, %s759_s14  ;;  %p765_p2 = scmp.lt.s32.totalorder %s759_s14, %s759_s14 }
   0x7   :  { %p766_p3 = por %p765_p2, %p764_p1 }
   0x9   :  { %p767_p4 = pnand %p766_p3, %p760_p0 }
   0xb   :  { %770 = shalt.err (!%p767_p4)
}
   0xc   :  { %s818_s15 = smov 256   ;;  %s819_s16 = smov 16  }
   0xd   :  { %22 = dma.hbm_to_vmem [thread:$0]  %s963_s0, 12288, %s17_s13, [#allocation3], %s818_s15, %s818_s15, %s819_s16  }
   0xe   :  { %s820_s19 = smov [#allocation5]  }
   0xf   :  { %s28_s20 = sshll.u32 %s820_s19, 4  ;;  %s29_s20 = int_to_ptr.vmem [resolvable:$true] %s28_s20 }
  0x10   :  { %s779_s21 = scalar_lea.vmem %s29_s20, 8192  ;;  %p784_p6 = scmp.lt.s32.totalorder %s29_s20, %s29_s20 }
  0x11   :  { %p780_p5 = scmp.ne.s32.totalorder %s29_s20, %s779_s21  ;;  %p785_p7 = scmp.lt.s32.totalorder %s779_s21, %s779_s21 }
  0x13   :  { %p786_p8 = por %p785_p7, %p784_p6 }
  0x15   :  { %p787_p9 = pnand %p786_p8, %p780_p5 }
  0x17   :  { %790 = shalt.err (!%p787_p9)
}
  0x18   :  { %34 = dma.hbm_to_vmem [thread:$0]  %s964_s1, 8192, %s29_s20, [#allocation6], %s818_s15, %s818_s15, %s819_s16  }
  0x19   :  { %811 = dma.done.wait [#allocation3], 12288  }
  0x1a   :  { %812 = vsyncadd [#allocation3], 4294955008 }
  0x1b   :  { %813 = dma.done.wait [#allocation6], 8192  }
  0x1c   :  { %814 = vsyncadd [#allocation6], 4294959104  ;;  %v170_v0 = vld [vmem:[#allocation5 + $0xf8] sm:$0xff]  ;;  %v169_v1 = vld [vmem:[#allocation5 + $0xf0] sm:$0xff] }
  0x1d   :  { %v168_v2 = vld [vmem:[#allocation5 + $0xe8] sm:$0xff]  ;;  %215 = vmatprep.subr.mxu0 %v170_v0  ;;  %682 = vmatprep.subr.mxu1 %v170_v0  ;;  %v167_v3 = vld [vmem:[#allocation5 + $0xe0] sm:$0xff]  ;;  %v166_v4 = vld [vmem:[#allocation5 + $0xd8] sm:$0xff] }
  0x1e   :  { %216 = vmatpush1.xpose.msra.mxu0 %v169_v1  ;;  %714 = vmatpush1.xpose.msra.mxu1 %v169_v1  ;;  %v165_v5 = vld [vmem:[#allocation5 + $0xd0] sm:$0xff]  ;;  %v164_v6 = vld [vmem:[#allocation5 + $0xc8] sm:$0xff]  ;;  %v163_v7 = vld [vmem:[#allocation5 + $0xc0] sm:$0xff] }
  0x1f   :  { %217 = vmatprep.subr.mxu0 %v168_v2  ;;  %683 = vmatprep.subr.mxu1 %v168_v2  ;;  %v162_v8 = vld [vmem:[#allocation5 + $0xb8] sm:$0xff]  ;;  %v161_v9 = vld [vmem:[#allocation5 + $0xb0] sm:$0xff]  ;;  %v160_v10 = vld [vmem:[#allocation5 + $0xa8] sm:$0xff] }
  0x20   :  { %v159_v11 = vld [vmem:[#allocation5 + $0xa0] sm:$0xff]  ;;  %v158_v12 = vld [vmem:[#allocation5 + $0x98] sm:$0xff]  ;;  %v44_v13 = vld [vmem:[#allocation2 + $0x8] sm:$0xff] }
  0x21   :  { %v92_v14 = vld [vmem:[#allocation2 + $0x188] sm:$0xff]  ;;  %v157_v15 = vld [vmem:[#allocation5 + $0x90] sm:$0xff]  ;;  %279 = vmatprep.mubr.f32.mxu0 %v44_v13  ;;  %v155_v17 = vld [vmem:[#allocation5 + $0x80] sm:$0xff] }
  0x22   :  { %218 = vmatpush1.xpose.msra.mxu0 %v167_v3  ;;  %715 = vmatpush1.xpose.msra.mxu1 %v167_v3  ;;  %v156_v16 = vld [vmem:[#allocation5 + $0x88] sm:$0xff]  ;;  %v154_v18 = vld [vmem:[#allocation5 + $0x78] sm:$0xff]  ;;  %v153_v19 = vld [vmem:[#allocation5 + $0x70] sm:$0xff] }
  0x23   :  { %219 = vmatprep.subr.mxu0 %v166_v4  ;;  %684 = vmatprep.subr.mxu1 %v166_v4  ;;  %v152_v20 = vld [vmem:[#allocation5 + $0x68] sm:$0xff]  ;;  %v151_v21 = vld [vmem:[#allocation5 + $0x60] sm:$0xff]  ;;  %v150_v22 = vld [vmem:[#allocation5 + $0x58] sm:$0xff] }
  0x24   :  { %423 = vmatprep.mubr.f32.mxu1 %v92_v14  ;;  %v149_v23 = vld [vmem:[#allocation5 + $0x50] sm:$0xff]  ;;  %v148_v24 = vld [vmem:[#allocation5 + $0x48] sm:$0xff]  ;;  %v147_v25 = vld [vmem:[#allocation5 + $0x40] sm:$0xff] }
  0x25   :  { %v146_v26 = vld [vmem:[#allocation5 + $0x38] sm:$0xff]  ;;  %v145_v27 = vld [vmem:[#allocation5 + $0x30] sm:$0xff]  ;;  %v144_v28 = vld [vmem:[#allocation5 + $0x28] sm:$0xff] }
  0x26   :  { %220 = vmatpush1.xpose.msra.mxu0 %v165_v5  ;;  %716 = vmatpush1.xpose.msra.mxu1 %v165_v5  ;;  %v143_v29 = vld [vmem:[#allocation5 + $0x20] sm:$0xff]  ;;  %v142_v30 = vld [vmem:[#allocation5 + $0x18] sm:$0xff]  ;;  %v141_v31 = vld [vmem:[#allocation5 + $0x10] sm:$0xff] }
  0x27   :  { %221 = vmatprep.subr.mxu0 %v164_v6  ;;  %685 = vmatprep.subr.mxu1 %v164_v6  ;;  %v140_v32 = vld [vmem:[#allocation5 + $0x8] sm:$0xff]  ;;  %v139_v33 = vld [vmem:[#allocation5] sm:$0xff]  ;;  %v202_v34 = vld [vmem:[#allocation5 + $0x1f8] sm:$0xff] }
  0x28   :  { %v201_v35 = vld [vmem:[#allocation5 + $0x1f0] sm:$0xff]  ;;  %v200_v36 = vld [vmem:[#allocation5 + $0x1e8] sm:$0xff]  ;;  %v199_v37 = vld [vmem:[#allocation5 + $0x1e0] sm:$0xff] }
  0x29   :  { %v198_v38 = vld [vmem:[#allocation5 + $0x1d8] sm:$0xff]  ;;  %v197_v39 = vld [vmem:[#allocation5 + $0x1d0] sm:$0xff]  ;;  %v196_v40 = vld [vmem:[#allocation5 + $0x1c8] sm:$0xff] }
  0x2a   :  { %222 = vmatpush1.xpose.msra.mxu0 %v163_v7  ;;  %717 = vmatpush1.xpose.msra.mxu1 %v163_v7  ;;  %v195_v41 = vld [vmem:[#allocation5 + $0x1c0] sm:$0xff]  ;;  %v194_v42 = vld [vmem:[#allocation5 + $0x1b8] sm:$0xff]  ;;  %v193_v43 = vld [vmem:[#allocation5 + $0x1b0] sm:$0xff] }
  0x2b   :  { %223 = vmatprep.subr.mxu0 %v162_v8  ;;  %686 = vmatprep.subr.mxu1 %v162_v8  ;;  %v192_v44 = vld [vmem:[#allocation5 + $0x1a8] sm:$0xff]  ;;  %v191_v45 = vld [vmem:[#allocation5 + $0x1a0] sm:$0xff]  ;;  %v190_v46 = vld [vmem:[#allocation5 + $0x198] sm:$0xff] }
  0x2c   :  { %v189_v47 = vld [vmem:[#allocation5 + $0x190] sm:$0xff]  ;;  %v188_v48 = vld [vmem:[#allocation5 + $0x188] sm:$0xff]  ;;  %v187_v49 = vld [vmem:[#allocation5 + $0x180] sm:$0xff] }
  0x2d   :  { %v186_v50 = vld [vmem:[#allocation5 + $0x178] sm:$0xff]  ;;  %v185_v51 = vld [vmem:[#allocation5 + $0x170] sm:$0xff]  ;;  %v184_v52 = vld [vmem:[#allocation5 + $0x168] sm:$0xff] }
  0x2e   :  { %224 = vmatpush1.xpose.msra.mxu0 %v161_v9  ;;  %718 = vmatpush1.xpose.msra.mxu1 %v161_v9  ;;  %v183_v53 = vld [vmem:[#allocation5 + $0x160] sm:$0xff]  ;;  %v182_v54 = vld [vmem:[#allocation5 + $0x158] sm:$0xff]  ;;  %v181_v55 = vld [vmem:[#allocation5 + $0x150] sm:$0xff] }
  0x2f   :  { %225 = vmatprep.subr.mxu0 %v160_v10  ;;  %687 = vmatprep.subr.mxu1 %v160_v10  ;;  %v180_v56 = vld [vmem:[#allocation5 + $0x148] sm:$0xff]  ;;  %v179_v57 = vld [vmem:[#allocation5 + $0x140] sm:$0xff]  ;;  %v178_v58 = vld [vmem:[#allocation5 + $0x138] sm:$0xff] }
  0x30   :  { %v177_v59 = vld [vmem:[#allocation5 + $0x130] sm:$0xff]  ;;  %v176_v60 = vld [vmem:[#allocation5 + $0x128] sm:$0xff]  ;;  %v175_v61 = vld [vmem:[#allocation5 + $0x120] sm:$0xff] }
  0x31   :  { %v174_v62 = vld [vmem:[#allocation5 + $0x118] sm:$0xff]  ;;  %v173_v63 = vld [vmem:[#allocation5 + $0x110] sm:$0xff]  ;;  %v172_v0 = vld [vmem:[#allocation5 + $0x108] sm:$0xff] }
  0x32   :  { %226 = vmatpush1.xpose.msra.mxu0 %v159_v11  ;;  %719 = vmatpush1.xpose.msra.mxu1 %v159_v11  ;;  %v171_v1 = vld [vmem:[#allocation5 + $0x100] sm:$0xff]  ;;  %v46_v4 = vld [vmem:[#allocation2 + $0x18] sm:$0xff]  ;;  %v45_v6 = vld [vmem:[#allocation2 + $0x10] sm:$0xff] }
  0x33   :  { %227 = vmatprep.subr.mxu0 %v158_v12  ;;  %688 = vmatprep.subr.mxu1 %v158_v12  ;;  %v43_v2 = vld [vmem:[#allocation2] sm:$0xff]  ;;  %v94_v5 = vld [vmem:[#allocation2 + $0x198] sm:$0xff]  ;;  %v93_v7 = vld [vmem:[#allocation2 + $0x190] sm:$0xff] }
  0x34   :  { %v91_v3 = vld [vmem:[#allocation2 + $0x180] sm:$0xff]  ;;  %v48_v8 = vld [vmem:[#allocation2 + $0x28] sm:$0xff]  ;;  %v50_v12 = vld [vmem:[#allocation2 + $0x38] sm:$0xff] }
  0x35   :  { %v96_v9 = vld [vmem:[#allocation2 + $0x1a8] sm:$0xff]  ;;  %v47_v10 = vld [vmem:[#allocation2 + $0x20] sm:$0xff]  ;;  %v98_v13 = vld [vmem:[#allocation2 + $0x1b8] sm:$0xff] }
  0x36   :  { %228 = vmatpush1.xpose.msra.mxu0 %v157_v15  ;;  %720 = vmatpush1.xpose.msra.mxu1 %v157_v15  ;;  %v95_v11 = vld [vmem:[#allocation2 + $0x1a0] sm:$0xff]  ;;  %v49_v14 = vld [vmem:[#allocation2 + $0x30] sm:$0xff] }
  0x37   :  { %229 = vmatprep.subr.mxu0 %v156_v16  ;;  %689 = vmatprep.subr.mxu1 %v156_v16  ;;  %v97_v15 = vld [vmem:[#allocation2 + $0x1b0] sm:$0xff]  ;;  %v52_v16 = vld [vmem:[#allocation2 + $0x48] sm:$0xff] }
  0x3a   :  { %230 = vmatpush1.xpose.msra.mxu0 %v155_v17  ;;  %721 = vmatpush1.xpose.msra.mxu1 %v155_v17  ;;  %v100_v17 = vld [vmem:[#allocation2 + $0x1c8] sm:$0xff] }
  0x3b   :  { %231 = vmatprep.subr.mxu0 %v154_v18  ;;  %690 = vmatprep.subr.mxu1 %v154_v18  ;;  %v51_v18 = vld [vmem:[#allocation2 + $0x40] sm:$0xff] }
  0x3e   :  { %232 = vmatpush1.xpose.msra.mxu0 %v153_v19  ;;  %722 = vmatpush1.xpose.msra.mxu1 %v153_v19  ;;  %v99_v19 = vld [vmem:[#allocation2 + $0x1c0] sm:$0xff] }
  0x3f   :  { %233 = vmatprep.subr.mxu0 %v152_v20  ;;  %691 = vmatprep.subr.mxu1 %v152_v20  ;;  %v54_v20 = vld [vmem:[#allocation2 + $0x58] sm:$0xff] }
  0x42   :  { %234 = vmatpush1.xpose.msra.mxu0 %v151_v21  ;;  %723 = vmatpush1.xpose.msra.mxu1 %v151_v21  ;;  %v102_v21 = vld [vmem:[#allocation2 + $0x1d8] sm:$0xff] }
  0x43   :  { %235 = vmatprep.subr.mxu0 %v150_v22  ;;  %692 = vmatprep.subr.mxu1 %v150_v22  ;;  %v53_v22 = vld [vmem:[#allocation2 + $0x50] sm:$0xff] }
  0x46   :  { %236 = vmatpush1.xpose.msra.mxu0 %v149_v23  ;;  %724 = vmatpush1.xpose.msra.mxu1 %v149_v23  ;;  %v101_v23 = vld [vmem:[#allocation2 + $0x1d0] sm:$0xff] }
  0x47   :  { %237 = vmatprep.subr.mxu0 %v148_v24  ;;  %693 = vmatprep.subr.mxu1 %v148_v24  ;;  %v56_v24 = vld [vmem:[#allocation2 + $0x68] sm:$0xff] }
  0x4a   :  { %238 = vmatpush1.xpose.msra.mxu0 %v147_v25  ;;  %725 = vmatpush1.xpose.msra.mxu1 %v147_v25  ;;  %v104_v25 = vld [vmem:[#allocation2 + $0x1e8] sm:$0xff] }
  0x4b   :  { %239 = vmatprep.subr.mxu0 %v146_v26  ;;  %694 = vmatprep.subr.mxu1 %v146_v26  ;;  %v55_v26 = vld [vmem:[#allocation2 + $0x60] sm:$0xff] }
  0x4e   :  { %240 = vmatpush1.xpose.msra.mxu0 %v145_v27  ;;  %726 = vmatpush1.xpose.msra.mxu1 %v145_v27  ;;  %v103_v27 = vld [vmem:[#allocation2 + $0x1e0] sm:$0xff] }
  0x4f   :  { %241 = vmatprep.subr.mxu0 %v144_v28  ;;  %695 = vmatprep.subr.mxu1 %v144_v28  ;;  %v58_v28 = vld [vmem:[#allocation2 + $0x78] sm:$0xff] }
  0x52   :  { %242 = vmatpush1.xpose.msra.mxu0 %v143_v29  ;;  %727 = vmatpush1.xpose.msra.mxu1 %v143_v29  ;;  %v106_v29 = vld [vmem:[#allocation2 + $0x1f8] sm:$0xff] }
  0x53   :  { %243 = vmatprep.subr.mxu0 %v142_v30  ;;  %696 = vmatprep.subr.mxu1 %v142_v30  ;;  %v57_v30 = vld [vmem:[#allocation2 + $0x70] sm:$0xff] }
  0x56   :  { %244 = vmatpush1.xpose.msra.mxu0 %v141_v31  ;;  %728 = vmatpush1.xpose.msra.mxu1 %v141_v31  ;;  %v105_v31 = vld [vmem:[#allocation2 + $0x1f0] sm:$0xff] }
  0x57   :  { %245 = vmatprep.subr.mxu0 %v140_v32  ;;  %697 = vmatprep.subr.mxu1 %v140_v32  ;;  %v60_v32 = vld [vmem:[#allocation2 + $0x88] sm:$0xff] }
  0x5a   :  { %246 = vmatpush1.xpose.msra.mxu0 %v139_v33  ;;  %729 = vmatpush1.xpose.msra.mxu1 %v139_v33  ;;  %v108_v33 = vld [vmem:[#allocation2 + $0x208] sm:$0xff] }
  0x5b   :  { %247 = vmatprep.subr.mxu0 %v202_v34  ;;  %698 = vmatprep.subr.mxu1 %v202_v34  ;;  %v59_v34 = vld [vmem:[#allocation2 + $0x80] sm:$0xff] }
  0x5e   :  { %248 = vmatpush2.xpose.msra.mxu0 %v201_v35  ;;  %730 = vmatpush2.xpose.msra.mxu1 %v201_v35  ;;  %v107_v35 = vld [vmem:[#allocation2 + $0x200] sm:$0xff] }
  0x5f   :  { %249 = vmatprep.subr.mxu0 %v200_v36  ;;  %699 = vmatprep.subr.mxu1 %v200_v36  ;;  %v62_v36 = vld [vmem:[#allocation2 + $0x98] sm:$0xff] }
  0x62   :  { %250 = vmatpush2.xpose.msra.mxu0 %v199_v37  ;;  %731 = vmatpush2.xpose.msra.mxu1 %v199_v37  ;;  %v110_v37 = vld [vmem:[#allocation2 + $0x218] sm:$0xff] }
  0x63   :  { %251 = vmatprep.subr.mxu0 %v198_v38  ;;  %700 = vmatprep.subr.mxu1 %v198_v38  ;;  %v61_v38 = vld [vmem:[#allocation2 + $0x90] sm:$0xff] }
  0x66   :  { %252 = vmatpush2.xpose.msra.mxu0 %v197_v39  ;;  %732 = vmatpush2.xpose.msra.mxu1 %v197_v39  ;;  %v109_v39 = vld [vmem:[#allocation2 + $0x210] sm:$0xff] }
  0x67   :  { %253 = vmatprep.subr.mxu0 %v196_v40  ;;  %701 = vmatprep.subr.mxu1 %v196_v40  ;;  %v64_v40 = vld [vmem:[#allocation2 + $0xa8] sm:$0xff] }
  0x6a   :  { %254 = vmatpush2.xpose.msra.mxu0 %v195_v41  ;;  %733 = vmatpush2.xpose.msra.mxu1 %v195_v41  ;;  %v112_v41 = vld [vmem:[#allocation2 + $0x228] sm:$0xff] }
  0x6b   :  { %255 = vmatprep.subr.mxu0 %v194_v42  ;;  %702 = vmatprep.subr.mxu1 %v194_v42  ;;  %v63_v42 = vld [vmem:[#allocation2 + $0xa0] sm:$0xff] }
  0x6e   :  { %256 = vmatpush2.xpose.msra.mxu0 %v193_v43  ;;  %734 = vmatpush2.xpose.msra.mxu1 %v193_v43  ;;  %v111_v43 = vld [vmem:[#allocation2 + $0x220] sm:$0xff] }
  0x6f   :  { %257 = vmatprep.subr.mxu0 %v192_v44  ;;  %703 = vmatprep.subr.mxu1 %v192_v44  ;;  %v66_v44 = vld [vmem:[#allocation2 + $0xb8] sm:$0xff] }
  0x72   :  { %258 = vmatpush2.xpose.msra.mxu0 %v191_v45  ;;  %735 = vmatpush2.xpose.msra.mxu1 %v191_v45  ;;  %v114_v45 = vld [vmem:[#allocation2 + $0x238] sm:$0xff] }
  0x73   :  { %259 = vmatprep.subr.mxu0 %v190_v46  ;;  %704 = vmatprep.subr.mxu1 %v190_v46  ;;  %v65_v46 = vld [vmem:[#allocation2 + $0xb0] sm:$0xff] }
  0x76   :  { %260 = vmatpush2.xpose.msra.mxu0 %v189_v47  ;;  %736 = vmatpush2.xpose.msra.mxu1 %v189_v47  ;;  %v113_v47 = vld [vmem:[#allocation2 + $0x230] sm:$0xff] }
  0x77   :  { %261 = vmatprep.subr.mxu0 %v188_v48  ;;  %705 = vmatprep.subr.mxu1 %v188_v48  ;;  %v68_v48 = vld [vmem:[#allocation2 + $0xc8] sm:$0xff] }
  0x7a   :  { %262 = vmatpush2.xpose.msra.mxu0 %v187_v49  ;;  %737 = vmatpush2.xpose.msra.mxu1 %v187_v49  ;;  %v116_v49 = vld [vmem:[#allocation2 + $0x248] sm:$0xff] }
  0x7b   :  { %263 = vmatprep.subr.mxu0 %v186_v50  ;;  %706 = vmatprep.subr.mxu1 %v186_v50  ;;  %v67_v50 = vld [vmem:[#allocation2 + $0xc0] sm:$0xff] }
  0x7e   :  { %264 = vmatpush2.xpose.msra.mxu0 %v185_v51  ;;  %738 = vmatpush2.xpose.msra.mxu1 %v185_v51  ;;  %v115_v51 = vld [vmem:[#allocation2 + $0x240] sm:$0xff] }
  0x7f   :  { %265 = vmatprep.subr.mxu0 %v184_v52  ;;  %707 = vmatprep.subr.mxu1 %v184_v52  ;;  %v70_v52 = vld [vmem:[#allocation2 + $0xd8] sm:$0xff] }
  0x82   :  { %266 = vmatpush2.xpose.msra.mxu0 %v183_v53  ;;  %739 = vmatpush2.xpose.msra.mxu1 %v183_v53  ;;  %v118_v53 = vld [vmem:[#allocation2 + $0x258] sm:$0xff] }
  0x83   :  { %267 = vmatprep.subr.mxu0 %v182_v54  ;;  %708 = vmatprep.subr.mxu1 %v182_v54  ;;  %v69_v54 = vld [vmem:[#allocation2 + $0xd0] sm:$0xff] }
  0x86   :  { %268 = vmatpush2.xpose.msra.mxu0 %v181_v55  ;;  %740 = vmatpush2.xpose.msra.mxu1 %v181_v55  ;;  %v117_v55 = vld [vmem:[#allocation2 + $0x250] sm:$0xff] }
  0x87   :  { %269 = vmatprep.subr.mxu0 %v180_v56  ;;  %709 = vmatprep.subr.mxu1 %v180_v56  ;;  %v72_v56 = vld [vmem:[#allocation2 + $0xe8] sm:$0xff] }
  0x8a   :  { %270 = vmatpush2.xpose.msra.mxu0 %v179_v57  ;;  %741 = vmatpush2.xpose.msra.mxu1 %v179_v57  ;;  %v120_v57 = vld [vmem:[#allocation2 + $0x268] sm:$0xff] }
  0x8b   :  { %271 = vmatprep.subr.mxu0 %v178_v58  ;;  %710 = vmatprep.subr.mxu1 %v178_v58  ;;  %v71_v58 = vld [vmem:[#allocation2 + $0xe0] sm:$0xff] }
  0x8e   :  { %272 = vmatpush2.xpose.msra.mxu0 %v177_v59  ;;  %742 = vmatpush2.xpose.msra.mxu1 %v177_v59  ;;  %v119_v59 = vld [vmem:[#allocation2 + $0x260] sm:$0xff] }
  0x8f   :  { %273 = vmatprep.subr.mxu0 %v176_v60  ;;  %711 = vmatprep.subr.mxu1 %v176_v60  ;;  %v74_v60 = vld [vmem:[#allocation2 + $0xf8] sm:$0xff] }
  0x92   :  { %274 = vmatpush2.xpose.msra.mxu0 %v175_v61  ;;  %743 = vmatpush2.xpose.msra.mxu1 %v175_v61  ;;  %v122_v61 = vld [vmem:[#allocation2 + $0x278] sm:$0xff] }
  0x93   :  { %275 = vmatprep.subr.mxu0 %v174_v62  ;;  %712 = vmatprep.subr.mxu1 %v174_v62  ;;  %v73_v62 = vld [vmem:[#allocation2 + $0xf0] sm:$0xff] }
  0x96   :  { %276 = vmatpush2.xpose.msra.mxu0 %v173_v63  ;;  %744 = vmatpush2.xpose.msra.mxu1 %v173_v63  ;;  %v121_v63 = vld [vmem:[#allocation2 + $0x270] sm:$0xff] }
  0x97   :  { %277 = vmatprep.subr.mxu0 %v172_v0  ;;  %713 = vmatprep.subr.mxu1 %v172_v0  ;;  %v76_v0 = vld [vmem:[#allocation2 + $0x108] sm:$0xff] }
  0x9a   :  { %278 = vmatpush2.xpose.msra.mxu0 %v171_v1  ;;  %745 = vmatpush2.xpose.msra.mxu1 %v171_v1  ;;  %v124_v1 = vld [vmem:[#allocation2 + $0x288] sm:$0xff] }
  0x9d   :  { %280 = vmatmul.mubr.f32.vlgmr.msra.gmra.mxu0 %v43_v2  ;;  %424 = vmatmul.mubr.f32.vlgmr.msra.gmra.mxu1 %v91_v3  ;;  %v75_v2 = vld [vmem:[#allocation2 + $0x100] sm:$0xff] }
  0x9e   :  { %285 = vmatprep.mubr.f32.mxu0 %v46_v4  ;;  %429 = vmatprep.mubr.f32.mxu1 %v94_v5  ;;  %v123_v3 = vld [vmem:[#allocation2 + $0x280] sm:$0xff]  ;;  %v78_v4 = vld [vmem:[#allocation2 + $0x118] sm:$0xff] }
  0x9f   :  { %v126_v5 = vld [vmem:[#allocation2 + $0x298] sm:$0xff] }
  0xa1   :  { %286 = vmatmul.mubr.f32.gmra.mxu0 %v45_v6  ;;  %430 = vmatmul.mubr.f32.gmra.mxu1 %v93_v7  ;;  %v77_v6 = vld [vmem:[#allocation2 + $0x110] sm:$0xff] }
  0xa2   :  { %291 = vmatprep.mubr.f32.mxu0 %v48_v8  ;;  %435 = vmatprep.mubr.f32.mxu1 %v96_v9  ;;  %v125_v7 = vld [vmem:[#allocation2 + $0x290] sm:$0xff]  ;;  %v80_v8 = vld [vmem:[#allocation2 + $0x128] sm:$0xff] }
  0xa3   :  { %v128_v9 = vld [vmem:[#allocation2 + $0x2a8] sm:$0xff] }
  0xa5   :  { %292 = vmatmul.mubr.f32.gmra.mxu0 %v47_v10  ;;  %436 = vmatmul.mubr.f32.gmra.mxu1 %v95_v11  ;;  %v79_v10 = vld [vmem:[#allocation2 + $0x120] sm:$0xff] }
  0xa6   :  { %297 = vmatprep.mubr.f32.mxu0 %v50_v12  ;;  %441 = vmatprep.mubr.f32.mxu1 %v98_v13  ;;  %v127_v11 = vld [vmem:[#allocation2 + $0x2a0] sm:$0xff]  ;;  %v82_v12 = vld [vmem:[#allocation2 + $0x138] sm:$0xff] }
  0xa7   :  { %v130_v13 = vld [vmem:[#allocation2 + $0x2b8] sm:$0xff] }
  0xa9   :  { %298 = vmatmul.mubr.f32.gmra.mxu0 %v49_v14  ;;  %442 = vmatmul.mubr.f32.gmra.mxu1 %v97_v15  ;;  %v81_v14 = vld [vmem:[#allocation2 + $0x130] sm:$0xff] }
  0xaa   :  { %303 = vmatprep.mubr.f32.mxu0 %v52_v16  ;;  %447 = vmatprep.mubr.f32.mxu1 %v100_v17  ;;  %v129_v15 = vld [vmem:[#allocation2 + $0x2b0] sm:$0xff]  ;;  %v84_v16 = vld [vmem:[#allocation2 + $0x148] sm:$0xff] }
  0xab   :  { %v132_v17 = vld [vmem:[#allocation2 + $0x2c8] sm:$0xff] }
  0xad   :  { %304 = vmatmul.mubr.f32.gmra.mxu0 %v51_v18  ;;  %448 = vmatmul.mubr.f32.gmra.mxu1 %v99_v19  ;;  %v83_v18 = vld [vmem:[#allocation2 + $0x140] sm:$0xff] }
  0xae   :  { %309 = vmatprep.mubr.f32.mxu0 %v54_v20  ;;  %453 = vmatprep.mubr.f32.mxu1 %v102_v21  ;;  %v131_v19 = vld [vmem:[#allocation2 + $0x2c0] sm:$0xff]  ;;  %v86_v20 = vld [vmem:[#allocation2 + $0x158] sm:$0xff] }
  0xaf   :  { %v134_v21 = vld [vmem:[#allocation2 + $0x2d8] sm:$0xff] }
  0xb1   :  { %310 = vmatmul.mubr.f32.gmra.mxu0 %v53_v22  ;;  %454 = vmatmul.mubr.f32.gmra.mxu1 %v101_v23  ;;  %v85_v22 = vld [vmem:[#allocation2 + $0x150] sm:$0xff] }
  0xb2   :  { %315 = vmatprep.mubr.f32.mxu0 %v56_v24  ;;  %459 = vmatprep.mubr.f32.mxu1 %v104_v25  ;;  %v133_v23 = vld [vmem:[#allocation2 + $0x2d0] sm:$0xff]  ;;  %v88_v24 = vld [vmem:[#allocation2 + $0x168] sm:$0xff] }
  0xb3   :  { %v136_v25 = vld [vmem:[#allocation2 + $0x2e8] sm:$0xff] }
  0xb5   :  { %316 = vmatmul.mubr.f32.gmra.mxu0 %v55_v26  ;;  %460 = vmatmul.mubr.f32.gmra.mxu1 %v103_v27  ;;  %v87_v26 = vld [vmem:[#allocation2 + $0x160] sm:$0xff] }
  0xb6   :  { %321 = vmatprep.mubr.f32.mxu0 %v58_v28  ;;  %465 = vmatprep.mubr.f32.mxu1 %v106_v29  ;;  %v135_v27 = vld [vmem:[#allocation2 + $0x2e0] sm:$0xff]  ;;  %v90_v28 = vld [vmem:[#allocation2 + $0x178] sm:$0xff] }
  0xb7   :  { %v138_v29 = vld [vmem:[#allocation2 + $0x2f8] sm:$0xff] }
  0xb9   :  { %322 = vmatmul.mubr.f32.gmra.mxu0 %v57_v30  ;;  %466 = vmatmul.mubr.f32.gmra.mxu1 %v105_v31  ;;  %v89_v30 = vld [vmem:[#allocation2 + $0x170] sm:$0xff] }
  0xba   :  { %327 = vmatprep.mubr.f32.mxu0 %v60_v32  ;;  %471 = vmatprep.mubr.f32.mxu1 %v108_v33  ;;  %v137_v31 = vld [vmem:[#allocation2 + $0x2f0] sm:$0xff]  ;;  %v205_v32 = vlaneseq }
  0xbc   :  { %v206_v33 = vshrl.u32 %v205_v32, 7 }
  0xbd   :  { %328 = vmatmul.mubr.f32.gmra.mxu0 %v59_v34  ;;  %472 = vmatmul.mubr.f32.gmra.mxu1 %v107_v35  ;;  %v203_v35 = vld [vmem:[%s965_s2] sm:$0x3]  ;;  %s821_s2 = smov [#allocation7]  }
  0xbe   :  { %333 = vmatprep.mubr.f32.mxu0 %v62_v36  ;;  %477 = vmatprep.mubr.f32.mxu1 %v110_v37  ;;  %v207_v34 = vsub.s32 0, %v206_v33  ;;  %v211_v36 = vsub.s32 1, %v206_v33  ;;  %s669_s24 = sshll.u32 %s821_s2, 4  ;;  %s670_s24 = int_to_ptr.vmem [resolvable:$true] %s669_s24 }
  0xbf   :  { %s791_s25 = scalar_lea.vmem %s670_s24, 12288  ;;  %p796_p11 = scmp.lt.s32.totalorder %s670_s24, %s670_s24 }
  0xc0   :  { %v857_v37 = vrot.slane %v203_v35, %v207_v34  ;;  %p792_p10 = scmp.ne.s32.totalorder %s670_s24, %s791_s25  ;;  %p797_p12 = scmp.lt.s32.totalorder %s791_s25, %s791_s25 }
  0xc1   :  { %334 = vmatmul.mubr.f32.gmra.mxu0 %v61_v38  ;;  %478 = vmatmul.mubr.f32.gmra.mxu1 %v109_v39  ;;  %v859_v38 = vrot.slane %v203_v35, %v211_v36 }
  0xc2   :  { %339 = vmatprep.mubr.f32.mxu0 %v64_v40  ;;  %483 = vmatprep.mubr.f32.mxu1 %v112_v41  ;;  %p798_p13 = por %p797_p12, %p796_p11 }
  0xc4   :  { %p799_p0 = pnand %p798_p13, %p792_p10 }
  0xc5   :  { %340 = vmatmul.mubr.f32.gmra.mxu0 %v63_v42  ;;  %484 = vmatmul.mubr.f32.gmra.mxu1 %v111_v43 }
  0xc6   :  { %345 = vmatprep.mubr.f32.mxu0 %v66_v44  ;;  %489 = vmatprep.mubr.f32.mxu1 %v114_v45 }
  0xc9   :  { %346 = vmatmul.mubr.f32.gmra.mxu0 %v65_v46  ;;  %490 = vmatmul.mubr.f32.gmra.mxu1 %v113_v47 }
  0xca   :  { %351 = vmatprep.mubr.f32.mxu0 %v68_v48  ;;  %495 = vmatprep.mubr.f32.mxu1 %v116_v49 }
  0xcd   :  { %352 = vmatmul.mubr.f32.gmra.mxu0 %v67_v50  ;;  %496 = vmatmul.mubr.f32.gmra.mxu1 %v115_v51 }
  0xce   :  { %357 = vmatprep.mubr.f32.mxu0 %v70_v52  ;;  %501 = vmatprep.mubr.f32.mxu1 %v118_v53 }
  0xd1   :  { %358 = vmatmul.mubr.f32.gmra.mxu0 %v69_v54  ;;  %502 = vmatmul.mubr.f32.gmra.mxu1 %v117_v55 }
  0xd2   :  { %363 = vmatprep.mubr.f32.mxu0 %v72_v56  ;;  %507 = vmatprep.mubr.f32.mxu1 %v120_v57 }
  0xd5   :  { %364 = vmatmul.mubr.f32.gmra.mxu0 %v71_v58  ;;  %508 = vmatmul.mubr.f32.gmra.mxu1 %v119_v59 }
  0xd6   :  { %369 = vmatprep.mubr.f32.mxu0 %v74_v60  ;;  %513 = vmatprep.mubr.f32.mxu1 %v122_v61 }
  0xd9   :  { %370 = vmatmul.mubr.f32.gmra.mxu0 %v73_v62  ;;  %514 = vmatmul.mubr.f32.gmra.mxu1 %v121_v63 }
  0xda   :  { %375 = vmatprep.mubr.f32.mxu0 %v76_v0  ;;  %519 = vmatprep.mubr.f32.mxu1 %v124_v1 }
  0xdd   :  { %376 = vmatmul.mubr.f32.gmra.mxu0 %v75_v2  ;;  %520 = vmatmul.mubr.f32.gmra.mxu1 %v123_v3 }
  0xde   :  { %381 = vmatprep.mubr.f32.mxu0 %v78_v4  ;;  %525 = vmatprep.mubr.f32.mxu1 %v126_v5 }
  0xe1   :  { %382 = vmatmul.mubr.f32.gmra.mxu0 %v77_v6  ;;  %526 = vmatmul.mubr.f32.gmra.mxu1 %v125_v7 }
  0xe2   :  { %387 = vmatprep.mubr.f32.mxu0 %v80_v8  ;;  %531 = vmatprep.mubr.f32.mxu1 %v128_v9 }
  0xe5   :  { %388 = vmatmul.mubr.f32.gmra.mxu0 %v79_v10  ;;  %532 = vmatmul.mubr.f32.gmra.mxu1 %v127_v11 }
  0xe6   :  { %393 = vmatprep.mubr.f32.mxu0 %v82_v12  ;;  %537 = vmatprep.mubr.f32.mxu1 %v130_v13 }
  0xe9   :  { %394 = vmatmul.mubr.f32.gmra.mxu0 %v81_v14  ;;  %538 = vmatmul.mubr.f32.gmra.mxu1 %v129_v15 }
  0xea   :  { %399 = vmatprep.mubr.f32.mxu0 %v84_v16  ;;  %543 = vmatprep.mubr.f32.mxu1 %v132_v17 }
  0xed   :  { %400 = vmatmul.mubr.f32.gmra.mxu0 %v83_v18  ;;  %544 = vmatmul.mubr.f32.gmra.mxu1 %v131_v19 }
  0xee   :  { %405 = vmatprep.mubr.f32.mxu0 %v86_v20  ;;  %549 = vmatprep.mubr.f32.mxu1 %v134_v21 }
  0xf1   :  { %406 = vmatmul.mubr.f32.gmra.mxu0 %v85_v22  ;;  %550 = vmatmul.mubr.f32.gmra.mxu1 %v133_v23 }
  0xf2   :  { %411 = vmatprep.mubr.f32.mxu0 %v88_v24  ;;  %555 = vmatprep.mubr.f32.mxu1 %v136_v25 }
  0xf5   :  { %412 = vmatmul.mubr.f32.gmra.mxu0 %v87_v26  ;;  %556 = vmatmul.mubr.f32.gmra.mxu1 %v135_v27 }
  0xf6   :  { %417 = vmatprep.mubr.f32.mxu0 %v90_v28  ;;  %561 = vmatprep.mubr.f32.mxu1 %v138_v29 }
  0xf9   :  { %418 = vmatmul.mubr.f32.gmra.mxu0 %v89_v30  ;;  %562 = vmatmul.mubr.f32.gmra.mxu1 %v137_v31 }
 0x15d   :  { %v281_v39 = vpop.f32.mrf.mxu0  ;;  %v425_v40 = vpop.f32.mrf.mxu1 }
 0x15e   :  { %v282_v41 = vadd.f32 %v281_v39, %v857_v37  ;;  %v426_v42 = vadd.f32 %v425_v40, %v857_v37 }
 0x15f   :  { %v283_v43 = vpop.f32.mrf.mxu0  ;;  %v427_v44 = vpop.f32.mrf.mxu1 }
 0x160   :  { %568 = vst [vmem:[#allocation7] sm:$0xff] %v282_v41  ;;  %616 = vst [vmem:[#allocation7 + $0x180] sm:$0xff] %v426_v42  ;;  %v284_v45 = vadd.f32 %v283_v43, %v859_v38  ;;  %v428_v46 = vadd.f32 %v427_v44, %v859_v38 }
 0x161   :  { %v287_v47 = vpop.f32.mrf.mxu0  ;;  %v431_v48 = vpop.f32.mrf.mxu1 }
 0x162   :  { %569 = vst [vmem:[#allocation7 + $0x8] sm:$0xff] %v284_v45  ;;  %617 = vst [vmem:[#allocation7 + $0x188] sm:$0xff] %v428_v46  ;;  %v288_v49 = vadd.f32 %v287_v47, %v857_v37  ;;  %v432_v50 = vadd.f32 %v431_v48, %v857_v37 }
 0x163   :  { %v289_v51 = vpop.f32.mrf.mxu0  ;;  %v433_v52 = vpop.f32.mrf.mxu1 }
 0x164   :  { %570 = vst [vmem:[#allocation7 + $0x10] sm:$0xff] %v288_v49  ;;  %618 = vst [vmem:[#allocation7 + $0x190] sm:$0xff] %v432_v50  ;;  %v290_v53 = vadd.f32 %v289_v51, %v859_v38  ;;  %v434_v54 = vadd.f32 %v433_v52, %v859_v38 }
 0x165   :  { %v293_v55 = vpop.f32.mrf.mxu0  ;;  %v437_v56 = vpop.f32.mrf.mxu1 }
 0x166   :  { %571 = vst [vmem:[#allocation7 + $0x18] sm:$0xff] %v290_v53  ;;  %619 = vst [vmem:[#allocation7 + $0x198] sm:$0xff] %v434_v54  ;;  %v294_v57 = vadd.f32 %v293_v55, %v857_v37  ;;  %v438_v58 = vadd.f32 %v437_v56, %v857_v37 }
 0x167   :  { %v295_v59 = vpop.f32.mrf.mxu0  ;;  %v439_v60 = vpop.f32.mrf.mxu1 }
 0x168   :  { %572 = vst [vmem:[#allocation7 + $0x20] sm:$0xff] %v294_v57  ;;  %620 = vst [vmem:[#allocation7 + $0x1a0] sm:$0xff] %v438_v58  ;;  %v296_v61 = vadd.f32 %v295_v59, %v859_v38  ;;  %v440_v62 = vadd.f32 %v439_v60, %v859_v38 }
 0x169   :  { %v299_v63 = vpop.f32.mrf.mxu0  ;;  %v443_v0 = vpop.f32.mrf.mxu1 }
 0x16a   :  { %573 = vst [vmem:[#allocation7 + $0x28] sm:$0xff] %v296_v61  ;;  %621 = vst [vmem:[#allocation7 + $0x1a8] sm:$0xff] %v440_v62  ;;  %v300_v1 = vadd.f32 %v299_v63, %v857_v37  ;;  %v444_v2 = vadd.f32 %v443_v0, %v857_v37 }
 0x16b   :  { %v301_v3 = vpop.f32.mrf.mxu0  ;;  %v445_v4 = vpop.f32.mrf.mxu1 }
 0x16c   :  { %574 = vst [vmem:[#allocation7 + $0x30] sm:$0xff] %v300_v1  ;;  %622 = vst [vmem:[#allocation7 + $0x1b0] sm:$0xff] %v444_v2  ;;  %v302_v5 = vadd.f32 %v301_v3, %v859_v38  ;;  %v446_v6 = vadd.f32 %v445_v4, %v859_v38 }
 0x16d   :  { %v305_v7 = vpop.f32.mrf.mxu0  ;;  %v449_v8 = vpop.f32.mrf.mxu1 }
 0x16e   :  { %575 = vst [vmem:[#allocation7 + $0x38] sm:$0xff] %v302_v5  ;;  %623 = vst [vmem:[#allocation7 + $0x1b8] sm:$0xff] %v446_v6  ;;  %v306_v9 = vadd.f32 %v305_v7, %v857_v37  ;;  %v450_v10 = vadd.f32 %v449_v8, %v857_v37 }
 0x16f   :  { %v307_v11 = vpop.f32.mrf.mxu0  ;;  %v451_v12 = vpop.f32.mrf.mxu1 }
 0x170   :  { %576 = vst [vmem:[#allocation7 + $0x40] sm:$0xff] %v306_v9  ;;  %624 = vst [vmem:[#allocation7 + $0x1c0] sm:$0xff] %v450_v10  ;;  %v308_v13 = vadd.f32 %v307_v11, %v859_v38  ;;  %v452_v14 = vadd.f32 %v451_v12, %v859_v38 }
 0x171   :  { %v311_v15 = vpop.f32.mrf.mxu0  ;;  %v455_v16 = vpop.f32.mrf.mxu1 }
 0x172   :  { %577 = vst [vmem:[#allocation7 + $0x48] sm:$0xff] %v308_v13  ;;  %625 = vst [vmem:[#allocation7 + $0x1c8] sm:$0xff] %v452_v14  ;;  %v312_v17 = vadd.f32 %v311_v15, %v857_v37  ;;  %v456_v18 = vadd.f32 %v455_v16, %v857_v37 }
 0x173   :  { %v313_v19 = vpop.f32.mrf.mxu0  ;;  %v457_v20 = vpop.f32.mrf.mxu1 }
 0x174   :  { %578 = vst [vmem:[#allocation7 + $0x50] sm:$0xff] %v312_v17  ;;  %626 = vst [vmem:[#allocation7 + $0x1d0] sm:$0xff] %v456_v18  ;;  %v314_v21 = vadd.f32 %v313_v19, %v859_v38  ;;  %v458_v22 = vadd.f32 %v457_v20, %v859_v38 }
 0x175   :  { %v317_v23 = vpop.f32.mrf.mxu0  ;;  %v461_v24 = vpop.f32.mrf.mxu1 }
 0x176   :  { %579 = vst [vmem:[#allocation7 + $0x58] sm:$0xff] %v314_v21  ;;  %627 = vst [vmem:[#allocation7 + $0x1d8] sm:$0xff] %v458_v22  ;;  %v318_v25 = vadd.f32 %v317_v23, %v857_v37  ;;  %v462_v26 = vadd.f32 %v461_v24, %v857_v37 }
 0x177   :  { %v319_v27 = vpop.f32.mrf.mxu0  ;;  %v463_v28 = vpop.f32.mrf.mxu1 }
 0x178   :  { %580 = vst [vmem:[#allocation7 + $0x60] sm:$0xff] %v318_v25  ;;  %628 = vst [vmem:[#allocation7 + $0x1e0] sm:$0xff] %v462_v26  ;;  %v320_v29 = vadd.f32 %v319_v27, %v859_v38  ;;  %v464_v30 = vadd.f32 %v463_v28, %v859_v38 }
 0x179   :  { %v323_v31 = vpop.f32.mrf.mxu0  ;;  %v467_v32 = vpop.f32.mrf.mxu1 }
 0x17a   :  { %581 = vst [vmem:[#allocation7 + $0x68] sm:$0xff] %v320_v29  ;;  %629 = vst [vmem:[#allocation7 + $0x1e8] sm:$0xff] %v464_v30  ;;  %v324_v33 = vadd.f32 %v323_v31, %v857_v37  ;;  %v468_v34 = vadd.f32 %v467_v32, %v857_v37 }
 0x17b   :  { %v325_v35 = vpop.f32.mrf.mxu0  ;;  %v469_v36 = vpop.f32.mrf.mxu1 }
 0x17c   :  { %582 = vst [vmem:[#allocation7 + $0x70] sm:$0xff] %v324_v33  ;;  %630 = vst [vmem:[#allocation7 + $0x1f0] sm:$0xff] %v468_v34  ;;  %v326_v39 = vadd.f32 %v325_v35, %v859_v38  ;;  %v470_v40 = vadd.f32 %v469_v36, %v859_v38 }
 0x17d   :  { %v329_v41 = vpop.f32.mrf.mxu0  ;;  %v473_v42 = vpop.f32.mrf.mxu1 }
 0x17e   :  { %583 = vst [vmem:[#allocation7 + $0x78] sm:$0xff] %v326_v39  ;;  %631 = vst [vmem:[#allocation7 + $0x1f8] sm:$0xff] %v470_v40  ;;  %v330_v43 = vadd.f32 %v329_v41, %v857_v37  ;;  %v474_v44 = vadd.f32 %v473_v42, %v857_v37 }
 0x17f   :  { %v331_v45 = vpop.f32.mrf.mxu0  ;;  %v475_v46 = vpop.f32.mrf.mxu1 }
 0x180   :  { %584 = vst [vmem:[#allocation7 + $0x80] sm:$0xff] %v330_v43  ;;  %632 = vst [vmem:[#allocation7 + $0x200] sm:$0xff] %v474_v44  ;;  %v332_v47 = vadd.f32 %v331_v45, %v859_v38  ;;  %v476_v48 = vadd.f32 %v475_v46, %v859_v38 }
 0x181   :  { %v335_v49 = vpop.f32.mrf.mxu0  ;;  %v479_v50 = vpop.f32.mrf.mxu1 }
 0x182   :  { %585 = vst [vmem:[#allocation7 + $0x88] sm:$0xff] %v332_v47  ;;  %633 = vst [vmem:[#allocation7 + $0x208] sm:$0xff] %v476_v48  ;;  %v336_v51 = vadd.f32 %v335_v49, %v857_v37  ;;  %v480_v52 = vadd.f32 %v479_v50, %v857_v37 }
 0x183   :  { %v337_v53 = vpop.f32.mrf.mxu0  ;;  %v481_v54 = vpop.f32.mrf.mxu1 }
 0x184   :  { %586 = vst [vmem:[#allocation7 + $0x90] sm:$0xff] %v336_v51  ;;  %634 = vst [vmem:[#allocation7 + $0x210] sm:$0xff] %v480_v52  ;;  %v338_v55 = vadd.f32 %v337_v53, %v859_v38  ;;  %v482_v56 = vadd.f32 %v481_v54, %v859_v38 }
 0x185   :  { %v341_v57 = vpop.f32.mrf.mxu0  ;;  %v485_v58 = vpop.f32.mrf.mxu1 }
 0x186   :  { %587 = vst [vmem:[#allocation7 + $0x98] sm:$0xff] %v338_v55  ;;  %635 = vst [vmem:[#allocation7 + $0x218] sm:$0xff] %v482_v56  ;;  %v342_v59 = vadd.f32 %v341_v57, %v857_v37  ;;  %v486_v60 = vadd.f32 %v485_v58, %v857_v37 }
 0x187   :  { %v343_v61 = vpop.f32.mrf.mxu0  ;;  %v487_v62 = vpop.f32.mrf.mxu1 }
 0x188   :  { %588 = vst [vmem:[#allocation7 + $0xa0] sm:$0xff] %v342_v59  ;;  %636 = vst [vmem:[#allocation7 + $0x220] sm:$0xff] %v486_v60  ;;  %v344_v63 = vadd.f32 %v343_v61, %v859_v38  ;;  %v488_v0 = vadd.f32 %v487_v62, %v859_v38 }
 0x189   :  { %v347_v1 = vpop.f32.mrf.mxu0  ;;  %v491_v2 = vpop.f32.mrf.mxu1 }
 0x18a   :  { %589 = vst [vmem:[#allocation7 + $0xa8] sm:$0xff] %v344_v63  ;;  %637 = vst [vmem:[#allocation7 + $0x228] sm:$0xff] %v488_v0  ;;  %v348_v3 = vadd.f32 %v347_v1, %v857_v37  ;;  %v492_v4 = vadd.f32 %v491_v2, %v857_v37 }
 0x18b   :  { %v349_v5 = vpop.f32.mrf.mxu0  ;;  %v493_v6 = vpop.f32.mrf.mxu1 }
 0x18c   :  { %590 = vst [vmem:[#allocation7 + $0xb0] sm:$0xff] %v348_v3  ;;  %638 = vst [vmem:[#allocation7 + $0x230] sm:$0xff] %v492_v4  ;;  %v350_v7 = vadd.f32 %v349_v5, %v859_v38  ;;  %v494_v8 = vadd.f32 %v493_v6, %v859_v38 }
 0x18d   :  { %v353_v9 = vpop.f32.mrf.mxu0  ;;  %v497_v10 = vpop.f32.mrf.mxu1 }
 0x18e   :  { %591 = vst [vmem:[#allocation7 + $0xb8] sm:$0xff] %v350_v7  ;;  %639 = vst [vmem:[#allocation7 + $0x238] sm:$0xff] %v494_v8  ;;  %v354_v11 = vadd.f32 %v353_v9, %v857_v37  ;;  %v498_v12 = vadd.f32 %v497_v10, %v857_v37 }
 0x18f   :  { %v355_v13 = vpop.f32.mrf.mxu0  ;;  %v499_v14 = vpop.f32.mrf.mxu1 }
 0x190   :  { %592 = vst [vmem:[#allocation7 + $0xc0] sm:$0xff] %v354_v11  ;;  %640 = vst [vmem:[#allocation7 + $0x240] sm:$0xff] %v498_v12  ;;  %v356_v15 = vadd.f32 %v355_v13, %v859_v38  ;;  %v500_v16 = vadd.f32 %v499_v14, %v859_v38 }
 0x191   :  { %v359_v17 = vpop.f32.mrf.mxu0  ;;  %v503_v18 = vpop.f32.mrf.mxu1 }
 0x192   :  { %593 = vst [vmem:[#allocation7 + $0xc8] sm:$0xff] %v356_v15  ;;  %641 = vst [vmem:[#allocation7 + $0x248] sm:$0xff] %v500_v16  ;;  %v360_v19 = vadd.f32 %v359_v17, %v857_v37  ;;  %v504_v20 = vadd.f32 %v503_v18, %v857_v37 }
 0x193   :  { %v361_v21 = vpop.f32.mrf.mxu0  ;;  %v505_v22 = vpop.f32.mrf.mxu1 }
 0x194   :  { %594 = vst [vmem:[#allocation7 + $0xd0] sm:$0xff] %v360_v19  ;;  %642 = vst [vmem:[#allocation7 + $0x250] sm:$0xff] %v504_v20  ;;  %v362_v23 = vadd.f32 %v361_v21, %v859_v38  ;;  %v506_v24 = vadd.f32 %v505_v22, %v859_v38 }
 0x195   :  { %v365_v25 = vpop.f32.mrf.mxu0  ;;  %v509_v26 = vpop.f32.mrf.mxu1 }
 0x196   :  { %595 = vst [vmem:[#allocation7 + $0xd8] sm:$0xff] %v362_v23  ;;  %643 = vst [vmem:[#allocation7 + $0x258] sm:$0xff] %v506_v24  ;;  %v366_v27 = vadd.f32 %v365_v25, %v857_v37  ;;  %v510_v28 = vadd.f32 %v509_v26, %v857_v37 }
 0x197   :  { %v367_v29 = vpop.f32.mrf.mxu0  ;;  %v511_v30 = vpop.f32.mrf.mxu1 }
 0x198   :  { %596 = vst [vmem:[#allocation7 + $0xe0] sm:$0xff] %v366_v27  ;;  %644 = vst [vmem:[#allocation7 + $0x260] sm:$0xff] %v510_v28  ;;  %v368_v31 = vadd.f32 %v367_v29, %v859_v38  ;;  %v512_v32 = vadd.f32 %v511_v30, %v859_v38 }
 0x199   :  { %v371_v33 = vpop.f32.mrf.mxu0  ;;  %v515_v34 = vpop.f32.mrf.mxu1 }
 0x19a   :  { %597 = vst [vmem:[#allocation7 + $0xe8] sm:$0xff] %v368_v31  ;;  %645 = vst [vmem:[#allocation7 + $0x268] sm:$0xff] %v512_v32  ;;  %v372_v35 = vadd.f32 %v371_v33, %v857_v37  ;;  %v516_v36 = vadd.f32 %v515_v34, %v857_v37 }
 0x19b   :  { %v373_v39 = vpop.f32.mrf.mxu0  ;;  %v517_v40 = vpop.f32.mrf.mxu1 }
 0x19c   :  { %598 = vst [vmem:[#allocation7 + $0xf0] sm:$0xff] %v372_v35  ;;  %646 = vst [vmem:[#allocation7 + $0x270] sm:$0xff] %v516_v36  ;;  %v374_v41 = vadd.f32 %v373_v39, %v859_v38  ;;  %v518_v42 = vadd.f32 %v517_v40, %v859_v38 }
 0x19d   :  { %v377_v43 = vpop.f32.mrf.mxu0  ;;  %v521_v44 = vpop.f32.mrf.mxu1 }
 0x19e   :  { %599 = vst [vmem:[#allocation7 + $0xf8] sm:$0xff] %v374_v41  ;;  %647 = vst [vmem:[#allocation7 + $0x278] sm:$0xff] %v518_v42  ;;  %v378_v45 = vadd.f32 %v377_v43, %v857_v37  ;;  %v522_v46 = vadd.f32 %v521_v44, %v857_v37 }
 0x19f   :  { %v379_v47 = vpop.f32.mrf.mxu0  ;;  %v523_v48 = vpop.f32.mrf.mxu1 }
 0x1a0   :  { %600 = vst [vmem:[#allocation7 + $0x100] sm:$0xff] %v378_v45  ;;  %648 = vst [vmem:[#allocation7 + $0x280] sm:$0xff] %v522_v46  ;;  %v380_v49 = vadd.f32 %v379_v47, %v859_v38  ;;  %v524_v50 = vadd.f32 %v523_v48, %v859_v38 }
 0x1a1   :  { %v383_v51 = vpop.f32.mrf.mxu0  ;;  %v527_v52 = vpop.f32.mrf.mxu1 }
 0x1a2   :  { %601 = vst [vmem:[#allocation7 + $0x108] sm:$0xff] %v380_v49  ;;  %649 = vst [vmem:[#allocation7 + $0x288] sm:$0xff] %v524_v50  ;;  %v384_v53 = vadd.f32 %v383_v51, %v857_v37  ;;  %v528_v54 = vadd.f32 %v527_v52, %v857_v37 }
 0x1a3   :  { %v385_v55 = vpop.f32.mrf.mxu0  ;;  %v529_v56 = vpop.f32.mrf.mxu1 }
 0x1a4   :  { %602 = vst [vmem:[#allocation7 + $0x110] sm:$0xff] %v384_v53  ;;  %650 = vst [vmem:[#allocation7 + $0x290] sm:$0xff] %v528_v54  ;;  %v386_v57 = vadd.f32 %v385_v55, %v859_v38  ;;  %v530_v58 = vadd.f32 %v529_v56, %v859_v38 }
 0x1a5   :  { %v389_v59 = vpop.f32.mrf.mxu0  ;;  %v533_v60 = vpop.f32.mrf.mxu1 }
 0x1a6   :  { %603 = vst [vmem:[#allocation7 + $0x118] sm:$0xff] %v386_v57  ;;  %651 = vst [vmem:[#allocation7 + $0x298] sm:$0xff] %v530_v58  ;;  %v390_v61 = vadd.f32 %v389_v59, %v857_v37  ;;  %v534_v62 = vadd.f32 %v533_v60, %v857_v37 }
 0x1a7   :  { %v391_v63 = vpop.f32.mrf.mxu0  ;;  %v535_v0 = vpop.f32.mrf.mxu1 }
 0x1a8   :  { %604 = vst [vmem:[#allocation7 + $0x120] sm:$0xff] %v390_v61  ;;  %652 = vst [vmem:[#allocation7 + $0x2a0] sm:$0xff] %v534_v62  ;;  %v392_v1 = vadd.f32 %v391_v63, %v859_v38  ;;  %v536_v2 = vadd.f32 %v535_v0, %v859_v38 }
 0x1a9   :  { %v395_v3 = vpop.f32.mrf.mxu0  ;;  %v539_v4 = vpop.f32.mrf.mxu1 }
 0x1aa   :  { %605 = vst [vmem:[#allocation7 + $0x128] sm:$0xff] %v392_v1  ;;  %653 = vst [vmem:[#allocation7 + $0x2a8] sm:$0xff] %v536_v2  ;;  %v396_v5 = vadd.f32 %v395_v3, %v857_v37  ;;  %v540_v6 = vadd.f32 %v539_v4, %v857_v37 }
 0x1ab   :  { %v397_v7 = vpop.f32.mrf.mxu0  ;;  %v541_v8 = vpop.f32.mrf.mxu1 }
 0x1ac   :  { %606 = vst [vmem:[#allocation7 + $0x130] sm:$0xff] %v396_v5  ;;  %654 = vst [vmem:[#allocation7 + $0x2b0] sm:$0xff] %v540_v6  ;;  %v398_v9 = vadd.f32 %v397_v7, %v859_v38  ;;  %v542_v10 = vadd.f32 %v541_v8, %v859_v38 }
 0x1ad   :  { %v401_v11 = vpop.f32.mrf.mxu0  ;;  %v545_v12 = vpop.f32.mrf.mxu1 }
 0x1ae   :  { %607 = vst [vmem:[#allocation7 + $0x138] sm:$0xff] %v398_v9  ;;  %655 = vst [vmem:[#allocation7 + $0x2b8] sm:$0xff] %v542_v10  ;;  %v402_v13 = vadd.f32 %v401_v11, %v857_v37  ;;  %v546_v14 = vadd.f32 %v545_v12, %v857_v37 }
 0x1af   :  { %v403_v15 = vpop.f32.mrf.mxu0  ;;  %v547_v16 = vpop.f32.mrf.mxu1 }
 0x1b0   :  { %608 = vst [vmem:[#allocation7 + $0x140] sm:$0xff] %v402_v13  ;;  %656 = vst [vmem:[#allocation7 + $0x2c0] sm:$0xff] %v546_v14  ;;  %v404_v17 = vadd.f32 %v403_v15, %v859_v38  ;;  %v548_v18 = vadd.f32 %v547_v16, %v859_v38 }
 0x1b1   :  { %v407_v19 = vpop.f32.mrf.mxu0  ;;  %v551_v20 = vpop.f32.mrf.mxu1 }
 0x1b2   :  { %609 = vst [vmem:[#allocation7 + $0x148] sm:$0xff] %v404_v17  ;;  %657 = vst [vmem:[#allocation7 + $0x2c8] sm:$0xff] %v548_v18  ;;  %v408_v21 = vadd.f32 %v407_v19, %v857_v37  ;;  %v552_v22 = vadd.f32 %v551_v20, %v857_v37 }
 0x1b3   :  { %v409_v23 = vpop.f32.mrf.mxu0  ;;  %v553_v24 = vpop.f32.mrf.mxu1 }
 0x1b4   :  { %610 = vst [vmem:[#allocation7 + $0x150] sm:$0xff] %v408_v21  ;;  %658 = vst [vmem:[#allocation7 + $0x2d0] sm:$0xff] %v552_v22  ;;  %v410_v25 = vadd.f32 %v409_v23, %v859_v38  ;;  %v554_v26 = vadd.f32 %v553_v24, %v859_v38 }
 0x1b5   :  { %v413_v27 = vpop.f32.mrf.mxu0  ;;  %v557_v28 = vpop.f32.mrf.mxu1 }
 0x1b6   :  { %611 = vst [vmem:[#allocation7 + $0x158] sm:$0xff] %v410_v25  ;;  %659 = vst [vmem:[#allocation7 + $0x2d8] sm:$0xff] %v554_v26  ;;  %v414_v29 = vadd.f32 %v413_v27, %v857_v37  ;;  %v558_v30 = vadd.f32 %v557_v28, %v857_v37 }
 0x1b7   :  { %v415_v31 = vpop.f32.mrf.mxu0  ;;  %v559_v32 = vpop.f32.mrf.mxu1 }
 0x1b8   :  { %612 = vst [vmem:[#allocation7 + $0x160] sm:$0xff] %v414_v29  ;;  %660 = vst [vmem:[#allocation7 + $0x2e0] sm:$0xff] %v558_v30  ;;  %v416_v33 = vadd.f32 %v415_v31, %v859_v38  ;;  %v560_v34 = vadd.f32 %v559_v32, %v859_v38 }
 0x1b9   :  { %v419_v35 = vpop.f32.mrf.mxu0  ;;  %v563_v36 = vpop.f32.mrf.mxu1 }
 0x1ba   :  { %613 = vst [vmem:[#allocation7 + $0x168] sm:$0xff] %v416_v33  ;;  %661 = vst [vmem:[#allocation7 + $0x2e8] sm:$0xff] %v560_v34  ;;  %v420_v39 = vadd.f32 %v419_v35, %v857_v37  ;;  %v564_v40 = vadd.f32 %v563_v36, %v857_v37 }
 0x1bb   :  { %v421_v41 = vpop.f32.mrf.mxu0  ;;  %v565_v42 = vpop.f32.mrf.mxu1 }
 0x1bc   :  { %614 = vst [vmem:[#allocation7 + $0x170] sm:$0xff] %v420_v39  ;;  %662 = vst [vmem:[#allocation7 + $0x2f0] sm:$0xff] %v564_v40  ;;  %v422_v43 = vadd.f32 %v421_v41, %v859_v38  ;;  %v566_v44 = vadd.f32 %v565_v42, %v859_v38 }
 0x1be   :  { %615 = vst [vmem:[#allocation7 + $0x178] sm:$0xff] %v422_v43  ;;  %663 = vst [vmem:[#allocation7 + $0x2f8] sm:$0xff] %v566_v44 }
 0x1bf   :  { %802 = shalt.err (!%p799_p0)
}
 0x1c0   :  { %675 = dma.vmem_to_hbm [thread:$0]  %s670_s24, 12288, %s966_s3, [#allocation4], %s818_s15, %s818_s15, %s819_s16  }
 0x1c1   :  { %815 = dma.done.wait [#allocation4], 12288  }
 0x1c2   :  { %816 = vsyncadd [#allocation4], 4294955008 }
 0x1c3   :  { %679 = vsyncpa [#allocation3], 1 }
 0x1c4   :  { %680 = vsyncpa [#allocation6], 1 }
 0x1c5   :  { %681 = vsyncpa [#allocation4], 1 }

</bundles_post_ra>
